<compile_context>
chip_gen: v6e
topology: v6e:2x2x1
jax: 0.10.0
libtpu: 0.0.40
codegen_flags: <defaults>
</compile_context>

<pallas_src>
import functools

import jax
import jax.numpy as jnp
from jax.experimental import pallas as pl
from jax.experimental.pallas import tpu as pltpu

_LANE = 128          # TPU lane width (last dim)
_SUBLANE_BF16 = 16   # bf16 sublane packing granularity
_MAX_TILE_M = 512    # rows per grid step (review: sweep 512/1024; 512 is v7x-safe)


def _round_up(x, m):
    return (x + m - 1) // m * m


@functools.lru_cache(maxsize=1)
def _vmem_capacity_bytes():
    """Per-core VMEM capacity; conservative fallback if the query is unavailable."""
    try:
        return int(pltpu.get_tpu_info().vmem_capacity_bytes)
    except Exception:
        return 64 * 1024 * 1024  # v7x per-TC VMEM (smallest current part)


def _encoder_deep_kernel(x_ref, w1t_ref, w2t_ref, out_ref):
    # Layer 1: (TM, Din) @ (Din, H_p) -> f32 accumulate, cast to bf16
    # (matches the bf16 PyTorch Linear output feeding layer 2).
    h = jnp.dot(x_ref[...], w1t_ref[...], preferred_element_type=jnp.float32)
    h = h.astype(jnp.bfloat16)
    # Layer 2: (TM, H_p) @ (H_p, Dout) -> f32 accumulate, store bf16.
    out_ref[...] = jnp.dot(
        h, w2t_ref[...], preferred_element_type=jnp.float32
    ).astype(out_ref.dtype)


def prepare_encoder_weights(w1, w2):
    """One-time weight prep (outside the hot path).

    w1: (hidden_dim, input_dim) bf16, w2: (output_dim, hidden_dim) bf16.
    Returns (w1t, w2t): transposed, with ONLY the hidden dim zero-padded to a
    lane multiple.  Shapes (input_dim, H_p) and (H_p, output_dim).  Zero padding
    of the hidden dim keeps the math exact (zero weight cols -> zero h cols ->
    multiplied by zero weight rows).
    """
    hidden, d_in = w1.shape
    d_out, hidden2 = w2.shape
    assert hidden == hidden2, (w1.shape, w2.shape)
    h_p = _round_up(hidden, _LANE)
    # TODO(synk): on v6e/v7x (2x256x256 MXU) round the hidden/output lane dims
    # to 256 for large encoders; at these sizes 128 is fine.
    w1t = jnp.zeros((d_in, h_p), dtype=jnp.bfloat16).at[:, :hidden].set(
        w1.T.astype(jnp.bfloat16))
    w2t = jnp.zeros((h_p, d_out), dtype=jnp.bfloat16).at[:hidden, :].set(
        w2.T.astype(jnp.bfloat16))
    return w1t, w2t


@jax.jit
def encoder_deep_forward(x, w1t, w2t):
    """x: (..., input_dim); w1t/w2t from prepare_encoder_weights. Returns (..., output_dim) bf16."""
    lead = x.shape[:-1]
    d_in = x.shape[-1]
    d_in_w, h_p = w1t.shape
    h_p2, d_out = w2t.shape
    assert d_in == d_in_w and h_p == h_p2, (x.shape, w1t.shape, w2t.shape)

    m = 1
    for s in lead:
        m *= s
    x2d = x.reshape(m, d_in).astype(jnp.bfloat16)   # no-op cast if already bf16

    # Row tile: full extent when small (exempt from divisibility rules, no
    # padding / partial blocks), otherwise 512-row tiles with a partial last
    # block for ragged M (garbage rows only ever produce discarded outputs).
    tile_m = m if m <= _MAX_TILE_M else _MAX_TILE_M
    grid_m = pl.cdiv(m, tile_m)

    # VMEM budget: single-buffered resident weights + double-buffered x/out
    # blocks + f32/bf16 intermediates.  Cap derived from the actual chip.
    weight_bytes = (d_in * h_p + h_p * d_out) * 2                 # bf16, 1 buffer each
    act_bytes = 2 * tile_m * (d_in + d_out) * 2                   # double-buffered x / out
    interm_bytes = tile_m * h_p * 6 + tile_m * d_out * 4          # f32 + bf16 h, f32 out
    needed = weight_bytes + act_bytes + interm_bytes
    cap = int(0.85 * _vmem_capacity_bytes())
    if weight_bytes + (4 << 20) > cap:
        # TODO(synk): add a hidden/K-tiled fallback (second grid axis with an
        # f32 VMEM accumulator, 'arbitrary' semantics) for weights too large to
        # stay VMEM-resident (matters first on v7x's 64 MiB VMEM).
        raise ValueError(
            f"Encoder weights ({weight_bytes} bytes) do not fit in VMEM "
            f"(usable cap ~{cap} bytes); hidden/output dims too large for the "
            f"resident-weight fast path.")
    vmem_limit = int(min(cap, max(2 * needed, 32 * 1024 * 1024)))

    flops = 2 * m * (d_in * h_p + h_p * d_out)
    bytes_accessed = 2 * (m * d_in + d_in * h_p + h_p * d_out + m * d_out)

    out = pl.pallas_call(
        _encoder_deep_kernel,
        out_shape=jax.ShapeDtypeStruct((m, d_out), jnp.bfloat16),
        grid_spec=pltpu.PrefetchScalarGridSpec(
            num_scalar_prefetch=0,
            grid=(grid_m,),
            in_specs=[
                # Streamed activations: row-tiled, true feature dim (no K pad).
                pl.BlockSpec((tile_m, d_in), lambda i: (i, 0)),
                # Resident weights: constant block index, single-buffered.
                pl.BlockSpec((d_in, h_p), lambda i: (0, 0),
                             pipeline_mode=pl.Buffered(1)),
                pl.BlockSpec((h_p, d_out), lambda i: (0, 0),
                             pipeline_mode=pl.Buffered(1)),
            ],
            out_specs=pl.BlockSpec((tile_m, d_out), lambda i: (i, 0)),
        ),
        compiler_params=pltpu.CompilerParams(
            # TODO(synk): use pltpu.CORE_PARALLEL (or pl.core_map over a
            # tensorcore mesh) on the M axis to shard row tiles across v7x's
            # 2 TensorCores; kept "parallel" here for cross-generation safety.
            dimension_semantics=("parallel",),
            vmem_limit_bytes=vmem_limit,
        ),
        cost_estimate=pl.CostEstimate(
            flops=flops, transcendentals=0, bytes_accessed=bytes_accessed),
    )(x2d, w1t, w2t)

    return out.reshape(*lead, d_out)


def _reference(x, w1, w2):
    h = jnp.dot(x.astype(jnp.float32), w1.T.astype(jnp.float32)).astype(jnp.bfloat16)
    o = jnp.dot(h.astype(jnp.float32), w2.T.astype(jnp.float32)).astype(jnp.bfloat16)
    return o


if __name__ == "__main__":
    # Small shapes consistent with the module: batch=2, seq=8, dims 32 -> 64 -> 32.
    batch, seq = 2, 8
    input_dim, hidden_dim, output_dim = 32, 64, 32

    key = jax.random.PRNGKey(0)
    kx, k1, k2 = jax.random.split(key, 3)

    x = jax.random.normal(kx, (batch, seq, input_dim), dtype=jnp.float32).astype(jnp.bfloat16)
    # Deterministic "kaiming-uniform-like" init for the two Linear weights.
    w1 = (jax.random.uniform(k1, (hidden_dim, input_dim), dtype=jnp.float32,
                             minval=-1.0, maxval=1.0) / jnp.sqrt(input_dim)).astype(jnp.bfloat16)
    w2 = (jax.random.uniform(k2, (output_dim, hidden_dim), dtype=jnp.float32,
                             minval=-1.0, maxval=1.0) / jnp.sqrt(hidden_dim)).astype(jnp.bfloat16)

    # One-time weight prep (cached outside the hot path in real use).
    w1t, w2t = prepare_encoder_weights(w1, w2)

    out = encoder_deep_forward(x, w1t, w2t)
    jax.block_until_ready(out)

    ref = _reference(x, w1, w2)
    assert out.shape == (batch, seq, output_dim), out.shape
    assert out.dtype == jnp.bfloat16, out.dtype
    err = jnp.max(jnp.abs(out.astype(jnp.float32) - ref.astype(jnp.float32)))
    assert float(err) < 1e-1, f"max abs error too large: {err}"

    print("KERNEL_OK")
</pallas_src>

<mosaic_0001>
module attributes {stable_mosaic.version = 11 : i64} {
  func.func @_encoder_deep_kernel(%arg0: i32, %arg1: memref<16x32xbf16, #tpu.memory_space<vmem>>, %arg2: memref<32x128xbf16, #tpu.memory_space<vmem>>, %arg3: memref<128x32xbf16, #tpu.memory_space<vmem>>, %arg4: memref<16x32xbf16, #tpu.memory_space<vmem>>) attributes {dimension_semantics = [#tpu.dimension_semantics<parallel>], iteration_bounds = array<i64: 1>, scalar_prefetch = 0 : i64, scratch_operands = 0 : i64, tpu.core_type = #tpu.core_type<tc>, window_params = [{transform_indices = @transform_0, window_bounds = array<i64: 16, 32>}, {pipeline_mode = #tpu.pipeline_mode<synchronous>, transform_indices = @transform_1, window_bounds = array<i64: 32, 128>}, {pipeline_mode = #tpu.pipeline_mode<synchronous>, transform_indices = @transform_2, window_bounds = array<i64: 128, 32>}, {transform_indices = @transform_3, window_bounds = array<i64: 16, 32>}]} {
    %c0 = arith.constant 0 : index
    %c0_0 = arith.constant 0 : index
    %0 = vector.load %arg1[%c0, %c0_0] : memref<16x32xbf16, #tpu.memory_space<vmem>>, vector<16x32xbf16>
    %c0_1 = arith.constant 0 : index
    %c0_2 = arith.constant 0 : index
    %1 = vector.load %arg2[%c0_1, %c0_2] : memref<32x128xbf16, #tpu.memory_space<vmem>>, vector<32x128xbf16>
    %cst = arith.constant dense<0.000000e+00> : vector<16x128xf32>
    %2 = tpu.matmul %0, %1, %cst {dimension_numbers = #tpu.dot_dimension_numbers<[1], [0], [0], [1], [0, 0, 1, 1], [], []>} : vector<16x32xbf16>, vector<32x128xbf16>, vector<16x128xf32> -> vector<16x128xf32>
    %3 = arith.truncf %2 : vector<16x128xf32> to vector<16x128xbf16>
    %c0_3 = arith.constant 0 : index
    %c0_4 = arith.constant 0 : index
    %4 = vector.load %arg3[%c0_3, %c0_4] : memref<128x32xbf16, #tpu.memory_space<vmem>>, vector<128x32xbf16>
    %cst_5 = arith.constant dense<0.000000e+00> : vector<16x32xf32>
    %5 = tpu.matmul %3, %4, %cst_5 {dimension_numbers = #tpu.dot_dimension_numbers<[1], [0], [0], [1], [0, 0, 1, 1], [], []>} : vector<16x128xbf16>, vector<128x32xbf16>, vector<16x32xf32> -> vector<16x32xf32>
    %6 = arith.truncf %5 : vector<16x32xf32> to vector<16x32xbf16>
    %c0_6 = arith.constant 0 : index
    %c0_7 = arith.constant 0 : index
    %7 = vector.load %arg4[%c0_6, %c0_7] : memref<16x32xbf16, #tpu.memory_space<vmem>>, vector<16x32xbf16>
    tpu.vector_store %arg4[%c0_6, %c0_7], %6 {strides = array<i32>} : memref<16x32xbf16, #tpu.memory_space<vmem>>, vector<16x32xbf16>,
    return
  }
  func.func @transform_0(%arg0: i32) -> (i32, i32) {
    %c0_i32 = arith.constant 0 : i32
    %c0_i32_0 = arith.constant 0 : i32
    return %arg0, %c0_i32 : i32, i32
  }
  func.func @transform_1(%arg0: i32) -> (i32, i32) {
    %c0_i32 = arith.constant 0 : i32
    %c0_i32_0 = arith.constant 0 : i32
    %c0_i32_1 = arith.constant 0 : i32
    return %c0_i32, %c0_i32_0 : i32, i32
  }
  func.func @transform_2(%arg0: i32) -> (i32, i32) {
    %c0_i32 = arith.constant 0 : i32
    %c0_i32_0 = arith.constant 0 : i32
    %c0_i32_1 = arith.constant 0 : i32
    return %c0_i32, %c0_i32_0 : i32, i32
  }
  func.func @transform_3(%arg0: i32) -> (i32, i32) {
    %c0_i32 = arith.constant 0 : i32
    %c0_i32_0 = arith.constant 0 : i32
    return %arg0, %c0_i32 : i32, i32
  }
}

</mosaic_0001>

<bundles_post_ra>
// kernel: encoder_deep_forward.1
= control target key start
LH: loop header
LB: loop body
LE: loop exit
PB: predicated region body
PF: predicated region fallthrough
CT: control target
= control target key end

     0   :  { %v311_v1 = vmov 0.0   ;;  %vm312_vm0 = vmmov 0   ;;  %vm39_vm1 = vcmask 261120   ;;  %s372_s0 = inlined_call_operand.vmem [shape: bf16[16,32], index: 0, kind: input, shape index: {}]   ;;  %s373_s1 = inlined_call_operand.vmem [shape: bf16[32,128], index: 1, kind: input, shape index: {}]   ;;  %s374_s2 = inlined_call_operand.vmem [shape: bf16[128,32], index: 2, kind: input, shape index: {}]   ;;  %s375_s3 = inlined_call_operand.hbm [shape: bf16[16,32], index: 3, kind: output, shape index: {}]  }
   0x1   :  { %v278_v0 = vld [vmem:[%s373_s1 + $0x8] sm:$0xff]   ;;  %245 = vmatprep.subr.bf16.mxu0 %v311_v1  ;;  %253 = vmatprep.subr.bf16.mxu1 %v311_v1  ;;  %v279_v2 = vld [vmem:[%s373_s1] sm:$0xff]   ;;  %v281_v3 = vld [vmem:[%s374_s2 + $0x38] sm:$0xff]  }
   0x2   :  { %246 = vmatpush3.bf16.msra.mxu0 %v278_v0  ;;  %249 = vmatprep.mubr.msk.bf16.mxu0 %vm312_vm0, %v311_v1  ;;  %v280_v4 = vld [vmem:[%s372_s0] sm:$0xff]   ;;  %v282_v5 = vld [vmem:[%s374_s2 + $0x30] sm:$0xff]   ;;  %v283_v6 = vld [vmem:[%s374_s2 + $0x28] sm:$0xff]  }
   0x3   :  { %247 = vmatprep.subr.bf16.mxu0 %v311_v1  ;;  %269 = vmatprep.mubr.msk.bf16.mxu1 %vm312_vm0, %v311_v1 }
   0x4   :  { %254 = vmatpush3.bf16.msra.mxu1 %v281_v3 }
   0x5   :  { %255 = vmatprep.subr.bf16.mxu1 %v311_v1 }
   0x6   :  { %248 = vmatpush3.bf16.msra.mxu0 %v279_v2 }
   0x8   :  { %256 = vmatpush3.bf16.msra.mxu1 %v282_v5 }
   0x9   :  { %250 = vmatmul.mubr.msk.bf16.vlgmr.msra.gmra.mxu0 %vm39_vm1, %v280_v4  ;;  %257 = vmatprep.subr.bf16.mxu1 %v311_v1 }
   0xa   :  { %8 = vsyncpa [#allocation3], 0  ;;  %v284_v7 = vld [vmem:[%s374_s2 + $0x20] sm:$0xff]   ;;  %v285_v8 = vld [vmem:[%s374_s2 + $0x18] sm:$0xff]   ;;  %vm198_vm2 = vcmask 257024   ;;  %s313_s5 = smov [#allocation2]  }
   0xb   :  { %v286_v9 = vld [vmem:[%s374_s2 + $0x10] sm:$0xff]   ;;  %v287_v10 = vld [vmem:[%s374_s2 + $0x8] sm:$0xff]   ;;  %v288_v11 = vld [vmem:[%s374_s2] sm:$0xff]   ;;  %s206_s6 = sshll.u32 %s313_s5, 4  ;;  %s207_s6 = int_to_ptr.vmem [resolvable:$true] %s206_s6 }
   0xc   :  { %258 = vmatpush3.bf16.msra.mxu1 %v283_v6  ;;  %s289_s2 = scalar_lea.vmem %s207_s6, 128  ;;  %p294_p1 = scmp.lt.s32.totalorder %s207_s6, %s207_s6 }
   0xd   :  { %259 = vmatprep.subr.bf16.mxu1 %v311_v1  ;;  %p290_p0 = scmp.ne.s32.totalorder %s207_s6, %s289_s2  ;;  %p295_p2 = scmp.lt.s32.totalorder %s289_s2, %s289_s2 }
   0xf   :  { %p296_p3 = por %p295_p2, %p294_p1 }
  0x10   :  { %260 = vmatpush3.bf16.msra.mxu1 %v284_v7 }
  0x11   :  { %261 = vmatprep.subr.bf16.mxu1 %v311_v1  ;;  %p297_p4 = pnand %p296_p3, %p290_p0 }
  0x14   :  { %262 = vmatpush3.bf16.msra.mxu1 %v285_v8 }
  0x15   :  { %263 = vmatprep.subr.bf16.mxu1 %v311_v1 }
  0x18   :  { %264 = vmatpush3.bf16.msra.mxu1 %v286_v9 }
  0x19   :  { %265 = vmatprep.subr.bf16.mxu1 %v311_v1 }
  0x1c   :  { %266 = vmatpush3.bf16.msra.mxu1 %v287_v10 }
  0x1d   :  { %267 = vmatprep.subr.bf16.mxu1 %v311_v1 }
  0x20   :  { %268 = vmatpush3.bf16.msra.mxu1 %v288_v11 }
  0xc9   :  { %v77_v12 = vpop.f32.mrf.mxu0 }
  0xcb   :  { %v251_v13 = vpop.f32.mrf.mxu0 }
  0xcd   :  { %v80_v14 = vpop.f32.mrf.mxu0 }
  0xce   :  { %v84_v15 = vpack.c.bf16 %v80_v14, %v77_v12 }
  0xcf   :  { %v252_v16 = vpop.f32.mrf.mxu0 }
  0xd0   :  { %270 = vmatmul.mubr.bf16.vlgmr.msra.gmra.mxu1 %v84_v15 }
 0x190   :  { %v183_v17 = vpop.f32.mrf.mxu1 }
 0x191   :  { %v231_v18 = vpack.c.bf16 %v183_v17, %v183_v17 }
 0x192   :  { %v271_v19 = vpop.f32.mrf.mxu1 }
 0x193   :  { %199 = vst.msk [vmem:[#allocation2] sm:$0xf] %vm198_vm2, %v231_v18 }
 0x194   :  { %v186_v20 = vpop.f32.mrf.mxu1 }
 0x195   :  { %v232_v21 = vpack.c.bf16 %v186_v20, %v186_v20 }
 0x196   :  { %v272_v22 = vpop.f32.mrf.mxu1 }
 0x197   :  { %200 = vst.msk [vmem:[#allocation2 + $0x4] sm:$0xf] %vm198_vm2, %v232_v21 }
 0x198   :  { %300 = shalt.err (!%p297_p4)
}
 0x199   :  { %s314_s7 = smov 64   ;;  %s315_s8 = smov 4  }
 0x19a   :  { %212 = dma.vmem_to_hbm [thread:$0]  %s207_s6, 128, %s375_s3, [#allocation3], %s314_s7, %s314_s7, %s315_s8  }
 0x19b   :  { %309 = dma.done.wait [#allocation3], 128  }
 0x19c   :  { %310 = vsyncadd [#allocation3], 4294967168 }
 0x19d   :  { %216 = vsyncpa [#allocation3], 1 }

</bundles_post_ra>
